<compile_context>
chip_gen: v5e
topology: v5e:2x2
jax: 0.10.0
libtpu: 0.0.40
codegen_flags: <defaults>
</compile_context>

<pallas_src>
import functools

import jax
import jax.numpy as jnp
from jax import lax
from jax.experimental import pallas as pl
from jax.experimental.pallas import tpu as pltpu

LEAKY_SLOPE = 0.01   # nn.LeakyReLU default negative_slope
LANE = 128


def _round_up(n, m):
    return ((n + m - 1) // m) * m


def _pick_block_b(batch, max_block_b):
    """Batch tile: multiple of 16 (bf16 sublane packing), large enough to fill
    the MXU streaming dimension, but capped so the 'parallel' grid axis has at
    least 2 steps whenever the batch allows it (v7x has 2 TensorCores)."""
    b16 = _round_up(max(batch, 1), 16)
    if b16 <= 16:
        return 16
    two_steps = _round_up((b16 + 1) // 2, 16)
    return max(16, min(max_block_b, two_steps))


# ----------------------------- fused kernel ----------------------------------

def _make_fused_kernel(num_layers, nclasses):
    """kernel(x_ref, w0, b0, w1, b1, ..., wL, bL, o_ref).

    Weights are bf16 (padded to 128-lane multiples), biases f32 (1, d_pad),
    activations / elementwise math f32, matmul accumulation f32.
    """

    def kernel(*refs):
        x_ref = refs[0]
        o_ref = refs[-1]
        wb = refs[1:-1]

        y = x_ref[...]                                   # (TB, in_pad) f32
        # hidden layers: Linear + LeakyReLU, activations live in vregs
        for l in range(num_layers - 1):
            w = wb[2 * l][...]                           # bf16 (din_p, dout_p)
            b = wb[2 * l + 1][...]                       # f32  (1, dout_p)
            y = jnp.dot(y.astype(jnp.bfloat16), w,
                        preferred_element_type=jnp.float32) + b
            y = jnp.maximum(y, LEAKY_SLOPE * y)          # LeakyReLU (1 VALU op)

        # final layer: Linear + Softmax over the real class lanes only
        w = wb[2 * (num_layers - 1)][...]
        b = wb[2 * (num_layers - 1) + 1][...]
        logits = jnp.dot(y.astype(jnp.bfloat16), w,
                         preferred_element_type=jnp.float32) + b
        col = lax.broadcasted_iota(jnp.int32, logits.shape, 1)
        logits = jnp.where(col < nclasses, logits, -jnp.inf)   # mask padded lanes
        m = jnp.max(logits, axis=-1, keepdims=True)
        e = jnp.exp(logits - m)
        denom = jnp.sum(e, axis=-1, keepdims=True)
        o_ref[...] = (e / denom).astype(o_ref.dtype)     # exact divide: rows sum to 1

    return kernel


# ----------------------------- params ----------------------------------------

def init_params(key, layer_dims, nclasses):
    """PyTorch nn.Linear default init: U(-1/sqrt(fan_in), 1/sqrt(fan_in)).

    Weights stored transposed as (in_features, out_features) so each layer is
    x @ W + b.  Kept in f32 here; pad_params casts the padded copies to bf16.
    """
    params = []
    dims = list(layer_dims) + [nclasses]
    for in_size, out_size in zip(dims[:-1], dims[1:]):
        key, kw, kb = jax.random.split(key, 3)
        bound = 1.0 / jnp.sqrt(jnp.float32(in_size))
        w = jax.random.uniform(kw, (in_size, out_size), jnp.float32, -bound, bound)
        b = jax.random.uniform(kb, (out_size,), jnp.float32, -bound, bound)
        params.append((w, b))
    return params


def pad_params(params):
    """Zero-pad every weight/bias to multiples of 128 lanes and cast weights to
    bf16 — done ONCE, outside the per-step path."""
    padded = []
    for w, b in params:
        din, dout = w.shape
        din_p = _round_up(din, LANE)
        dout_p = _round_up(dout, LANE)
        w_p = jnp.zeros((din_p, dout_p), jnp.float32).at[:din, :dout].set(w)
        w_p = w_p.astype(jnp.bfloat16)                       # MXU-native operand
        b_p = jnp.zeros((1, dout_p), jnp.float32).at[0, :dout].set(b)
        padded.append((w_p, b_p))
    return padded


# ----------------------------- forward ----------------------------------------

@functools.partial(jax.jit, static_argnums=(2, 3))
def baseline_ff_forward(x, padded_params, nclasses, max_block_b=256):
    """Fused forward pass. x: (B, in_features) f32. Returns (B, nclasses) f32."""
    B, in_dim = x.shape
    num_layers = len(padded_params)
    in_pad = padded_params[0][0].shape[0]
    out_pad = padded_params[-1][0].shape[1]

    block_b = _pick_block_b(B, max_block_b)
    b_pad = _round_up(B, block_b)

    # Pad only the ragged tails (no full zero copy when shapes already align).
    pad_rows = b_pad - B
    pad_cols = in_pad - in_dim
    if pad_rows or pad_cols:
        x_p = jnp.pad(x, ((0, pad_rows), (0, pad_cols)))
    else:
        x_p = x

    flat = [t for pair in padded_params for t in pair]
    kernel = _make_fused_kernel(num_layers, nclasses)

    # activation tiled over batch; weights/biases VMEM-resident across grid steps
    in_specs = [pl.BlockSpec((block_b, in_pad), lambda i: (i, 0),
                             memory_space=pltpu.MemorySpace.VMEM)]
    for w_p, bias_p in padded_params:
        in_specs.append(pl.BlockSpec(w_p.shape, lambda i: (0, 0),
                                     memory_space=pltpu.MemorySpace.VMEM))
        in_specs.append(pl.BlockSpec(bias_p.shape, lambda i: (0, 0),
                                     memory_space=pltpu.MemorySpace.VMEM))

    out = pl.pallas_call(
        kernel,
        out_shape=jax.ShapeDtypeStruct((b_pad, out_pad), jnp.float32),
        grid=(b_pad // block_b,),
        in_specs=in_specs,
        out_specs=pl.BlockSpec((block_b, out_pad), lambda i: (i, 0),
                               memory_space=pltpu.MemorySpace.VMEM),
        compiler_params=pltpu.CompilerParams(
            dimension_semantics=("parallel",),
            vmem_limit_bytes=64 * 1024 * 1024),
    )(x_p, *flat)

    return out[:B, :nclasses]


# ----------------------------- main -------------------------------------------

if __name__ == "__main__":
    layer_dims = [32, 64, 48]   # includes input dim, excludes final class layer
    nclasses = 10
    batch = 24                  # ragged -> exercises tail padding + 2 grid steps

    key = jax.random.PRNGKey(0)
    key, kx = jax.random.split(key)
    x = jax.random.normal(kx, (batch, layer_dims[0]), jnp.float32)

    params = init_params(key, layer_dims, nclasses)
    padded = pad_params(params)

    out = baseline_ff_forward(x, padded, nclasses, 256)
    out = jax.block_until_ready(out)

    # pure-JAX f32 reference (eval-mode dropout = identity)
    ref = x
    for w, b in params[:-1]:
        ref = ref @ w + b
        ref = jnp.where(ref >= 0, ref, LEAKY_SLOPE * ref)
    w, b = params[-1]
    ref = jax.nn.softmax(ref @ w + b, axis=-1)

    assert out.shape == (batch, nclasses)
    # exact divide in the softmax -> tight sum-to-one check
    assert jnp.allclose(jnp.sum(out, axis=-1), 1.0, atol=1e-5)
    # bf16 matmul operands (f32 accumulation) -> small drift vs the f32 reference
    assert jnp.allclose(out, ref, atol=2e-2, rtol=2e-2)

    print("KERNEL_OK")
</pallas_src>

<mosaic_0001>
module attributes {stable_mosaic.version = 11 : i64} {
  func.func @kernel(%arg0: i32, %arg1: memref<16x128xf32, #tpu.memory_space<vmem>>, %arg2: memref<128x128xbf16, #tpu.memory_space<vmem>>, %arg3: memref<1x128xf32, #tpu.memory_space<vmem>>, %arg4: memref<128x128xbf16, #tpu.memory_space<vmem>>, %arg5: memref<1x128xf32, #tpu.memory_space<vmem>>, %arg6: memref<128x128xbf16, #tpu.memory_space<vmem>>, %arg7: memref<1x128xf32, #tpu.memory_space<vmem>>, %arg8: memref<16x128xf32, #tpu.memory_space<vmem>>) attributes {dimension_semantics = [#tpu.dimension_semantics<parallel>], iteration_bounds = array<i64: 2>, scalar_prefetch = 0 : i64, scratch_operands = 0 : i64, tpu.core_type = #tpu.core_type<tc>, window_params = [{transform_indices = @transform_0, window_bounds = array<i64: 16, 128>}, {pipeline_mode = #tpu.pipeline_mode<synchronous>, transform_indices = @transform_1, window_bounds = array<i64: 128, 128>}, {pipeline_mode = #tpu.pipeline_mode<synchronous>, transform_indices = @transform_2, window_bounds = array<i64: 1, 128>}, {pipeline_mode = #tpu.pipeline_mode<synchronous>, transform_indices = @transform_3, window_bounds = array<i64: 128, 128>}, {pipeline_mode = #tpu.pipeline_mode<synchronous>, transform_indices = @transform_4, window_bounds = array<i64: 1, 128>}, {pipeline_mode = #tpu.pipeline_mode<synchronous>, transform_indices = @transform_5, window_bounds = array<i64: 128, 128>}, {pipeline_mode = #tpu.pipeline_mode<synchronous>, transform_indices = @transform_6, window_bounds = array<i64: 1, 128>}, {transform_indices = @transform_7, window_bounds = array<i64: 16, 128>}]} {
    %c0 = arith.constant 0 : index
    %c0_0 = arith.constant 0 : index
    %0 = vector.load %arg1[%c0, %c0_0] : memref<16x128xf32, #tpu.memory_space<vmem>>, vector<16x128xf32>
    %c0_1 = arith.constant 0 : index
    %c0_2 = arith.constant 0 : index
    %1 = vector.load %arg2[%c0_1, %c0_2] : memref<128x128xbf16, #tpu.memory_space<vmem>>, vector<128x128xbf16>
    %c0_3 = arith.constant 0 : index
    %c0_4 = arith.constant 0 : index
    %2 = vector.load %arg3[%c0_3, %c0_4] : memref<1x128xf32, #tpu.memory_space<vmem>>, vector<1x128xf32>
    %3 = arith.truncf %0 : vector<16x128xf32> to vector<16x128xbf16>
    %cst = arith.constant dense<0.000000e+00> : vector<16x128xf32>
    %4 = tpu.matmul %3, %1, %cst {dimension_numbers = #tpu.dot_dimension_numbers<[1], [0], [0], [1], [0, 0, 1, 1], [], []>} : vector<16x128xbf16>, vector<128x128xbf16>, vector<16x128xf32> -> vector<16x128xf32>
    %5 = vector.broadcast %2 : vector<1x128xf32> to vector<16x128xf32>
    %6 = arith.addf %4, %5 : vector<16x128xf32>
    %cst_5 = arith.constant 0.00999999977 : f32
    %7 = vector.broadcast %cst_5 : f32 to vector<16x128xf32>
    %8 = arith.mulf %7, %6 : vector<16x128xf32>
    %9 = arith.maximumf %6, %8 : vector<16x128xf32>
    %c0_6 = arith.constant 0 : index
    %c0_7 = arith.constant 0 : index
    %10 = vector.load %arg4[%c0_6, %c0_7] : memref<128x128xbf16, #tpu.memory_space<vmem>>, vector<128x128xbf16>
    %c0_8 = arith.constant 0 : index
    %c0_9 = arith.constant 0 : index
    %11 = vector.load %arg5[%c0_8, %c0_9] : memref<1x128xf32, #tpu.memory_space<vmem>>, vector<1x128xf32>
    %12 = arith.truncf %9 : vector<16x128xf32> to vector<16x128xbf16>
    %cst_10 = arith.constant dense<0.000000e+00> : vector<16x128xf32>
    %13 = tpu.matmul %12, %10, %cst_10 {dimension_numbers = #tpu.dot_dimension_numbers<[1], [0], [0], [1], [0, 0, 1, 1], [], []>} : vector<16x128xbf16>, vector<128x128xbf16>, vector<16x128xf32> -> vector<16x128xf32>
    %14 = vector.broadcast %11 : vector<1x128xf32> to vector<16x128xf32>
    %15 = arith.addf %13, %14 : vector<16x128xf32>
    %cst_11 = arith.constant 0.00999999977 : f32
    %16 = vector.broadcast %cst_11 : f32 to vector<16x128xf32>
    %17 = arith.mulf %16, %15 : vector<16x128xf32>
    %18 = arith.maximumf %15, %17 : vector<16x128xf32>
    %c0_12 = arith.constant 0 : index
    %c0_13 = arith.constant 0 : index
    %19 = vector.load %arg6[%c0_12, %c0_13] : memref<128x128xbf16, #tpu.memory_space<vmem>>, vector<128x128xbf16>
    %c0_14 = arith.constant 0 : index
    %c0_15 = arith.constant 0 : index
    %20 = vector.load %arg7[%c0_14, %c0_15] : memref<1x128xf32, #tpu.memory_space<vmem>>, vector<1x128xf32>
    %21 = arith.truncf %18 : vector<16x128xf32> to vector<16x128xbf16>
    %cst_16 = arith.constant dense<0.000000e+00> : vector<16x128xf32>
    %22 = tpu.matmul %21, %19, %cst_16 {dimension_numbers = #tpu.dot_dimension_numbers<[1], [0], [0], [1], [0, 0, 1, 1], [], []>} : vector<16x128xbf16>, vector<128x128xbf16>, vector<16x128xf32> -> vector<16x128xf32>
    %23 = vector.broadcast %20 : vector<1x128xf32> to vector<16x128xf32>
    %24 = arith.addf %22, %23 : vector<16x128xf32>
    %25 = tpu.iota {dimensions = array<i32: 1>} : vector<16x128xi32>
    %c10_i32 = arith.constant 10 : i32
    %26 = vector.broadcast %c10_i32 : i32 to vector<16x128xi32>
    %27 = arith.cmpi slt, %25, %26 : vector<16x128xi32>
    %cst_17 = arith.constant 0xFF800000 : f32
    %28 = vector.broadcast %cst_17 : f32 to vector<16x128xf32>
    %29 = arith.select %27, %24, %28 : vector<16x128xi1>, vector<16x128xf32>
    %cst_18 = arith.constant dense<0xFF800000> : vector<16xf32>
    %30 = vector.multi_reduction <maximumf>, %29, %cst_18 [1] : vector<16x128xf32> to vector<16xf32>
    %31 = vector.shape_cast %30 : vector<16xf32> to vector<16x1xf32>
    %32 = vector.broadcast %31 : vector<16x1xf32> to vector<16x128xf32>
    %33 = arith.subf %29, %32 : vector<16x128xf32>
    %34 = math.exp %33 : vector<16x128xf32>
    %cst_19 = arith.constant dense<0.000000e+00> : vector<16xf32>
    %35 = vector.multi_reduction <add>, %34, %cst_19 [1] : vector<16x128xf32> to vector<16xf32>
    %36 = vector.shape_cast %35 : vector<16xf32> to vector<16x1xf32>
    %37 = vector.broadcast %36 : vector<16x1xf32> to vector<16x128xf32>
    %38 = arith.divf %34, %37 : vector<16x128xf32>
    %c0_20 = arith.constant 0 : index
    %c0_21 = arith.constant 0 : index
    %39 = vector.load %arg8[%c0_20, %c0_21] : memref<16x128xf32, #tpu.memory_space<vmem>>, vector<16x128xf32>
    tpu.vector_store %arg8[%c0_20, %c0_21], %38 {strides = array<i32>} : memref<16x128xf32, #tpu.memory_space<vmem>>, vector<16x128xf32>,
    return
  }
  func.func @transform_0(%arg0: i32) -> (i32, i32) {
    %c0_i32 = arith.constant 0 : i32
    %c0_i32_0 = arith.constant 0 : i32
    return %arg0, %c0_i32 : i32, i32
  }
  func.func @transform_1(%arg0: i32) -> (i32, i32) {
    %c0_i32 = arith.constant 0 : i32
    %c0_i32_0 = arith.constant 0 : i32
    %c0_i32_1 = arith.constant 0 : i32
    return %c0_i32, %c0_i32_0 : i32, i32
  }
  func.func @transform_2(%arg0: i32) -> (i32, i32) {
    %c0_i32 = arith.constant 0 : i32
    %c0_i32_0 = arith.constant 0 : i32
    %c0_i32_1 = arith.constant 0 : i32
    return %c0_i32, %c0_i32_0 : i32, i32
  }
  func.func @transform_3(%arg0: i32) -> (i32, i32) {
    %c0_i32 = arith.constant 0 : i32
    %c0_i32_0 = arith.constant 0 : i32
    %c0_i32_1 = arith.constant 0 : i32
    return %c0_i32, %c0_i32_0 : i32, i32
  }
  func.func @transform_4(%arg0: i32) -> (i32, i32) {
    %c0_i32 = arith.constant 0 : i32
    %c0_i32_0 = arith.constant 0 : i32
    %c0_i32_1 = arith.constant 0 : i32
    return %c0_i32, %c0_i32_0 : i32, i32
  }
  func.func @transform_5(%arg0: i32) -> (i32, i32) {
    %c0_i32 = arith.constant 0 : i32
    %c0_i32_0 = arith.constant 0 : i32
    %c0_i32_1 = arith.constant 0 : i32
    return %c0_i32, %c0_i32_0 : i32, i32
  }
  func.func @transform_6(%arg0: i32) -> (i32, i32) {
    %c0_i32 = arith.constant 0 : i32
    %c0_i32_0 = arith.constant 0 : i32
    %c0_i32_1 = arith.constant 0 : i32
    return %c0_i32, %c0_i32_0 : i32, i32
  }
  func.func @transform_7(%arg0: i32) -> (i32, i32) {
    %c0_i32 = arith.constant 0 : i32
    %c0_i32_0 = arith.constant 0 : i32
    return %arg0, %c0_i32 : i32, i32
  }
}

</mosaic_0001>

<bundles_post_ra>
// kernel: baseline_ff_forward.1
= control target key start
LH: loop header
LB: loop body
LE: loop exit
PB: predicated region body
PF: predicated region fallthrough
CT: control target
= control target key end

     0   :  { %12 = vsyncpa [#allocation3], 0  ;;  %s1137_s0 = inlined_call_operand.vmem [shape: f32[32,128], index: 0, kind: input, shape index: {}]   ;;  %s1138_s1 = inlined_call_operand.hbm [shape: bf16[128,128], index: 1, kind: input, shape index: {}]   ;;  %s1139_s2 = inlined_call_operand.vmem [shape: f32[1,128], index: 2, kind: input, shape index: {}]   ;;  %s1140_s3 = inlined_call_operand.hbm [shape: bf16[128,128], index: 3, kind: input, shape index: {}]   ;;  %s1141_s4 = inlined_call_operand.vmem [shape: f32[1,128], index: 4, kind: input, shape index: {}]   ;;  %s1142_s5 = inlined_call_operand.hbm [shape: bf16[128,128], index: 5, kind: input, shape index: {}]   ;;  %s1143_s6 = inlined_call_operand.vmem [shape: f32[1,128], index: 6, kind: input, shape index: {}]   ;;  %s1144_s7 = inlined_call_operand.vmem [shape: f32[32,128], index: 7, kind: output, shape index: {}]  }
   0x1   :  { %13 = vsyncpa [#allocation5], 0  ;;  %s1069_s24 = smov 0  }
   0x2 LB: > { %s729_s25 = sadd.s32 4294967295, %s1022_s24   ;;  %p731_p0 = scmp.ge.s32.totalorder %s1022_s24, 1  ;;  %s1022_s24 = sphi %s1069_s24, %s19_s24  }
   0x3   : > { %p202_p1 = scmp.lt.s32.totalorder %s1022_s24, 3  ;;  %p1079_p2 = scmp.eq.s32.totalorder %s729_s25, 0 }
   0x4   : > { %s230_s29 = sshll.u32 %s1140_s3, 4  ;;  %s213_s10 = sshll.u32 %s1138_s1, 4  ;;  %s231_s29 = int_to_ptr.hbm [resolvable:$true] %s230_s29  ;;  %s214_s10 = int_to_ptr.hbm [resolvable:$true] %s213_s10 }
   0x5   : > { %p1086_p3 = pnand %p731_p0, %p202_p1  ;;  %s1024_s11 = smov [#allocation4]  }
   0x6   : > { %s232_s12 = sshll.u32 %s1024_s11, 4  ;;  %s1025_s13 = smov [#allocation2]   ;;  %s233_s12 = int_to_ptr.vmem [resolvable:$true] %s232_s12 }
   0x7   : > { %p878_p4 = pneg %p1086_p3  ;;  %s215_s14 = sshll.u32 %s1025_s13, 4  ;;  %s216_s14 = int_to_ptr.vmem [resolvable:$true] %s215_s14 }
   0x8   : > { %s247_s17 = sshll.u32 %s1142_s5, 4  ;;  %s1026_s18 = smov 64   ;;  %s248_s17 = int_to_ptr.hbm [resolvable:$true] %s247_s17 }
   0x9   : > { %p879_p5 = pnand %p1079_p2, %p878_p4  ;;  %s1027_s19 = smov 4  }
   0xa   : > { %s1028_s20 = smov [#allocation6]   ;;  %277 = sbr.rel (%p1086_p3) target bundleno = 740 (0x2e4), region = 48 }
   0xb   : > { %884 = dma.hbm_to_vmem [thread:$0]  (!%p879_p5), %s231_s29, 1024, %s233_s12, [#allocation5], %s1026_s18, %s1026_s18, %s1027_s19  }
   0xc   : > { %881 = dma.hbm_to_vmem [thread:$0]  (!%p879_p5), %s214_s10, 1024, %s216_s14, [#allocation3], %s1026_s18, %s1026_s18, %s1027_s19  }
   0xd   : > { %s249_s21 = sshll.u32 %s1028_s20, 4  ;;  %s250_s21 = int_to_ptr.vmem [resolvable:$true] %s249_s21 }
   0xe   : > { %887 = dma.hbm_to_vmem [thread:$0]  (!%p879_p5), %s248_s17, 1024, %s250_s21, [#allocation5], %s1026_s18, %s1026_s18, %s1027_s19  }
   0xf   : > { %1013 = dma.done.wait (%p1079_p2), [#allocation3], 1024  }
  0x10   : > { %1015 = vsyncadd (%p1079_p2), [#allocation3], 4294966272 }
  0x11   : > { %1017 = dma.done.wait (%p1079_p2), [#allocation5], 2048  }
  0x12   : > { %1019 = vsyncadd (%p1079_p2), [#allocation5], 4294965248  ;;  %v849_v0 = vld [vmem:[#allocation2 + $0x38] sm:$0xff]  ;;  %v848_v1 = vld [vmem:[#allocation2 + $0x30] sm:$0xff]  ;;  %s740_s22 = sshll.u32 %s729_s25, 1  ;;  %v591_v47 = vlaneseq }
  0x13   : > { %403 = vmatpush.bf16.msra.mxu0 %v849_v0  ;;  %v857_v2 = vld [vmem:[#allocation4 + $0x38] sm:$0xff]  ;;  %v856_v3 = vld [vmem:[#allocation4 + $0x30] sm:$0xff]  ;;  %v847_v4 = vld [vmem:[#allocation2 + $0x28] sm:$0xff]  ;;  %p321_p6 = scmp.lt.s32.totalorder %s740_s22, 3 }
  0x14   : > { %490 = vmatpush.bf16.msra.mxu1 %v857_v2  ;;  %v855_v5 = vld [vmem:[#allocation4 + $0x28] sm:$0xff]  ;;  %v846_v6 = vld [vmem:[#allocation2 + $0x20] sm:$0xff]  ;;  %v845_v8 = vld [vmem:[#allocation2 + $0x18] sm:$0xff]  ;;  %v592_v48 = vand.u32 127, %v591_v47 }
  0x15   : > { %v854_v7 = vld [vmem:[#allocation4 + $0x20] sm:$0xff]  ;;  %s1148_s22 = smov (!%p321_p6, %s740_s22), 3  ;;  %v844_v9 = vld [vmem:[#allocation2 + $0x10] sm:$0xff]  ;;  %v843_v10 = vld [vmem:[#allocation2 + $0x8] sm:$0xff] }
  0x16   : > { %s741_s23 = sshll.u32 %s1148_s22, 3  ;;  %v842_v11 = vld [vmem:[#allocation2] sm:$0xff]  ;;  %v853_v15 = vld [vmem:[#allocation4 + $0x18] sm:$0xff]  ;;  %v852_v16 = vld [vmem:[#allocation4 + $0x10] sm:$0xff]  ;;  %vm593_vm0 = vcmp.lt.s32.totalorder %v592_v48, 10 }
  0x17   : > { %404 = vmatpush.bf16.msra.mxu0 %v848_v1  ;;  %s324_s27 = scalar_lea.vmem %s1137_s0, %s741_s23  ;;  %v851_v17 = vld [vmem:[#allocation4 + $0x8] sm:$0xff]  ;;  %v850_v18 = vld [vmem:[#allocation4] sm:$0xff]  ;;  %v865_v19 = vld [vmem:[#allocation6 + $0x38] sm:$0xff]  ;;  %s330_s13 = scalar_lea.vmem %s1144_s7, %s741_s23 }
  0x18   : > { %491 = vmatpush.bf16.msra.mxu1 %v856_v3  ;;  %v332_v12 = vld [vmem:[%s324_s27] sm:$0xff]  ;;  %v333_v13 = vld [vmem:[%s324_s27 + $0x8] sm:$0xff]  ;;  %577 = vmatpush.bf16.msra.mxu2 %v865_v19  ;;  %v864_v20 = vld [vmem:[#allocation6 + $0x30] sm:$0xff] }
  0x19   : > { %v351_v14 = vpack.c.bf16 %v333_v13, %v332_v12  ;;  %v863_v21 = vld [vmem:[#allocation6 + $0x28] sm:$0xff]  ;;  %v862_v22 = vld [vmem:[#allocation6 + $0x20] sm:$0xff]  ;;  %v861_v33 = vld [vmem:[#allocation6 + $0x18] sm:$0xff] }
  0x1a   : > { %v907_v24 = vld [vmem:[%s1139_s2] ss:$0 sm:$0xff]  ;;  %v860_v34 = vld [vmem:[#allocation6 + $0x10] sm:$0xff]  ;;  %v859_v35 = vld [vmem:[#allocation6 + $0x8] sm:$0xff] }
  0x1b   : > { %405 = vmatpush.bf16.msra.mxu0 %v847_v4  ;;  %v858_v36 = vld [vmem:[#allocation6] sm:$0xff] }
  0x1c   : > { %492 = vmatpush.bf16.msra.mxu1 %v855_v5  ;;  %578 = vmatpush.bf16.msra.mxu2 %v864_v20  ;;  %v908_v38 = vld [vmem:[%s1141_s4] ss:$0 sm:$0xff] }
  0x1d   : > { %v909_v49 = vld [vmem:[%s1143_s6] ss:$0 sm:$0xff] }
  0x1f   : > { %406 = vmatpush.bf16.msra.mxu0 %v846_v6 }
  0x20   : > { %493 = vmatpush.bf16.msra.mxu1 %v854_v7  ;;  %579 = vmatpush.bf16.msra.mxu2 %v863_v21 }
  0x23   : > { %407 = vmatpush.bf16.msra.mxu0 %v845_v8 }
  0x24   : > { %494 = vmatpush.bf16.msra.mxu1 %v853_v15  ;;  %580 = vmatpush.bf16.msra.mxu2 %v862_v22 }
  0x27   : > { %408 = vmatpush.bf16.msra.mxu0 %v844_v9 }
  0x28   : > { %495 = vmatpush.bf16.msra.mxu1 %v852_v16  ;;  %581 = vmatpush.bf16.msra.mxu2 %v861_v33 }
  0x2b   : > { %409 = vmatpush.bf16.msra.mxu0 %v843_v10 }
  0x2c   : > { %496 = vmatpush.bf16.msra.mxu1 %v851_v17  ;;  %582 = vmatpush.bf16.msra.mxu2 %v860_v34 }
  0x2f   : > { %410 = vmatpush.bf16.msra.mxu0 %v842_v11 }
  0x30   : > { %497 = vmatpush.bf16.msra.mxu1 %v850_v18  ;;  %583 = vmatpush.bf16.msra.mxu2 %v859_v35 }
  0x32   : > { %411 = vmatmul.bf16.vlgmr.msra.gmra.mxu0 %v351_v14 }
  0x34   : > { %584 = vmatpush.bf16.msra.mxu2 %v858_v36 }
  0xaf   : > { %v412_v23 = vpop.f32.mrf.mxu0 }
  0xb0   : > { %v413_v25 = vadd.f32 %v907_v24, %v412_v23 }
  0xb2   : > { %v417_v27 = vmul.f32 0.01, %v413_v25 }
  0xb4   : > { %v419_v30 = vmax.f32 %v413_v25, %v417_v27 }
  0xb7   : > { %v414_v26 = vpop.f32.mrf.mxu0 }
  0xb8   : > { %v415_v28 = vadd.f32 %v907_v24, %v414_v26 }
  0xba   : > { %v418_v29 = vmul.f32 0.01, %v415_v28 }
  0xbc   : > { %v420_v31 = vmax.f32 %v415_v28, %v418_v29 }
  0xbe   : > { %v438_v32 = vpack.c.bf16 %v420_v31, %v419_v30 }
  0xc0   : > { %498 = vmatmul.bf16.vlgmr.msra.gmra.mxu1 %v438_v32 }
 0x13d   : > { %v499_v37 = vpop.f32.mrf.mxu1 }
 0x13e   : > { %v500_v39 = vadd.f32 %v908_v38, %v499_v37 }
 0x140   : > { %v504_v41 = vmul.f32 0.01, %v500_v39 }
 0x142   : > { %v506_v44 = vmax.f32 %v500_v39, %v504_v41 }
 0x145   : > { %v501_v40 = vpop.f32.mrf.mxu1 }
 0x146   : > { %v502_v42 = vadd.f32 %v908_v38, %v501_v40 }
 0x148   : > { %v505_v43 = vmul.f32 0.01, %v502_v42 }
 0x14a   : > { %v507_v45 = vmax.f32 %v502_v42, %v505_v43 }
 0x14c   : > { %v525_v46 = vpack.c.bf16 %v507_v45, %v506_v44 }
 0x14e   : > { %585 = vmatmul.bf16.vlgmr.msra.gmra.mxu2 %v525_v46 }
 0x1d1   : > { %v586_v50 = vpop.f32.mrf.mxu2 }
 0x1d2   : > { %v587_v51 = vadd.f32 %v909_v49, %v586_v50 }
 0x1d4   : > { %v594_v52 = vsel %vm593_vm0, %v587_v51, -inf }
 0x1d5   : > { %596 = vmax.xlane.f32.xlu0 %v594_v52 }
 0x1d9   : > { %v588_v53 = vpop.f32.mrf.mxu2 }
 0x1da   : > { %v589_v54 = vadd.f32 %v909_v49, %v588_v53 }
 0x1dc   : > { %v595_v55 = vsel %vm593_vm0, %v589_v54, -inf }
 0x1dd   : > { %598 = vmax.xlane.f32.xlu0 %v595_v55 }
 0x248   : > { %v597_v56 = vpop.xlane.xlu0 %596 }
 0x249   : > { %v600_v57 = vsub.f32 %v594_v52, %v597_v56 }
 0x24b   : > { %v602_v58 = vmul.f32 1.442695, %v600_v57 }
 0x24d   : > { %910 = vpow2.f32 %v602_v58 }
 0x250   : > { %v599_v59 = vpop.xlane.xlu0 %598 }
 0x251   : > { %v601_v60 = vsub.f32 %v595_v55, %v599_v59 }
 0x253   : > { %v911_v61 = vpop.eup %910  ;;  %v604_v62 = vmul.f32 1.442695, %v601_v60 }
 0x254   : > { %606 = vadd.xlane.f32.xlu1 %v911_v61 }
 0x255   : > { %912 = vpow2.f32 %v604_v62 }
 0x25b   : > { %v913_v63 = vpop.eup %912 }
 0x25c   : > { %608 = vadd.xlane.f32.xlu1 %v913_v63 }
 0x2c7   : > { %v607_v0 = vpop.xlane.xlu1 %606 }
 0x2c8   : > { %914 = vrcp.f32 %v607_v0  ;;  %v621_v5 = vand.u32 2147483648, %v607_v0  ;;  %v619_v7 = vand.u32 2147483647, %v607_v0  ;;  %vm615_vm2 = vweird.f32 %v607_v0 }
 0x2ca   : > { %v622_v10 = vor.u32 1.1754944e-38, %v621_v5  ;;  %vm620_vm4 = vcmp.eq.f32.partialorder %v619_v7, 8.507059e+37 }
 0x2ce   : > { %v915_v1 = vpop.eup %914 }
 0x2cf   : > { %v611_v2 = vmul.f32 %v915_v1, %v607_v0  ;;  %v609_v3 = vpop.xlane.xlu1 %608  ;;  %vm616_vm1 = vweird.f32 %v915_v1 }
 0x2d0   : > { %916 = vrcp.f32 %v609_v3  ;;  %vm617_vm3 = vmor %vm615_vm2, %vm616_vm1  ;;  %v636_v16 = vand.u32 2147483648, %v609_v3  ;;  %v634_v18 = vand.u32 2147483647, %v609_v3  ;;  %vm630_vm6 = vweird.f32 %v609_v3 }
 0x2d1   : > { %v612_v4 = vsub.f32 1.0, %v611_v2 }
 0x2d2   : > { %v637_v20 = vor.u32 1.1754944e-38, %v636_v16  ;;  %vm635_vm8 = vcmp.eq.f32.partialorder %v634_v18, 8.507059e+37 }
 0x2d3   : > { %v613_v6 = vmul.f32 %v915_v1, %v612_v4 }
 0x2d5   : > { %v614_v8 = vadd.f32 %v915_v1, %v613_v6 }
 0x2d6   : > { %v917_v9 = vpop.eup %916 }
 0x2d7   : > { %v618_v11 = vsel %vm617_vm3, %v915_v1, %v614_v8  ;;  %v626_v12 = vmul.f32 %v917_v9, %v609_v3  ;;  %vm631_vm5 = vweird.f32 %v917_v9 }
 0x2d8   : > { %v623_v13 = vsel %vm620_vm4, %v622_v10, %v618_v11  ;;  %vm632_vm7 = vmor %vm630_vm6, %vm631_vm5 }
 0x2d9   : > { %v624_v14 = vmul.f32 %v911_v61, %v623_v13  ;;  %v627_v15 = vsub.f32 1.0, %v626_v12 }
 0x2db   : > { %640 = vst [vmem:[%s330_s13] sm:$0xff] %v624_v14  ;;  %v628_v17 = vmul.f32 %v917_v9, %v627_v15 }
 0x2dd   : > { %v629_v19 = vadd.f32 %v917_v9, %v628_v17 }
 0x2df   : > { %v633_v21 = vsel %vm632_vm7, %v917_v9, %v629_v19 }
 0x2e0   : > { %v638_v22 = vsel %vm635_vm8, %v637_v20, %v633_v21 }
 0x2e1   : > { %v639_v23 = vmul.f32 %v913_v63, %v638_v22 }
 0x2e3   : > { %641 = vst [vmem:[%s330_s13 + $0x8] sm:$0xff] %v639_v23 }
 0x2e4 PF: > { %s19_s24 = sadd.s32 1, %s1022_s24  }
 0x2e5   : > { %p16_p7 = scmp.ge.s32.totalorder %s19_s24, 4  }
 0x2e7   :  { %18 = sbr.rel (!%p16_p7) target bundleno = 2 (0x2), region = 91 }
 0x2ec   :  { %664 = vsyncpa [#allocation3], 1 }
 0x2ed   :  { %666 = vsyncpa [#allocation3 + $0x1], 1 }
 0x2ee   :  { %667 = vsyncpa [#allocation5], 1 }

</bundles_post_ra>
